<compile_context>
chip_gen: v7x
topology: tpu7x:2x2x1
jax: 0.10.0
libtpu: 0.0.40
codegen_flags: <defaults>
</compile_context>

<pallas_src>
from functools import partial

import numpy as np
import jax
import jax.numpy as jnp
from jax import lax
from jax.experimental import pallas as pl
from jax.experimental.pallas import tpu as pltpu

D_PROB = 0.5                       # dropout probability (module default)
_SCALE = 1.0 / (1.0 - D_PROB)      # survivor scale
# keep iff hash >= _THRESH  =>  P(keep) = 1 - p   (exact for p = 0.5; for p
# extremely close to 1 the clamp introduces a ~2^-32 bias — negligible).
_THRESH = min(int(round(D_PROB * 4294967296.0)), 4294967295)
_GOLD = 0x9E3779B9                 # golden-ratio constant for the hash combine


def _mix(h, k):
    """uint32 hash combine using only add/xor/shift (no integer multiplies)."""
    return h ^ (k + np.uint32(_GOLD) + (h << 6) + (h >> 2))


def dropout_linear_relu_kernel(seed_ref, x_ref, w_ref, o_ref, *, training=True):
    # seed_ref: SMEM (1,)   int32
    # x_ref:    VMEM (TB,N) f32
    # w_ref:    VMEM (1, N) f32   (torch Linear(N,1,bias=False).weight layout)
    # o_ref:    VMEM (TB,1) f32
    tb, n = x_ref.shape

    if training:
        # --- on-chip dropout mask: counter hash of (global_row, col, seed) ---
        rows = lax.broadcasted_iota(jnp.int32, (tb, n), 0) + pl.program_id(0) * tb
        cols = lax.broadcasted_iota(jnp.int32, (tb, n), 1)
        h = seed_ref[0].astype(jnp.uint32)
        h = _mix(h, rows.astype(jnp.uint32))
        h = _mix(h, cols.astype(jnp.uint32))
        # final avalanche (add/xor/shift only, uint32 wrap-around is intended)
        h = h ^ (h >> 16)
        h = h + (h << 3)
        h = h ^ (h >> 11)
        h = h + (h << 15)
        h = h ^ (h >> 16)
        keep = h >= np.uint32(_THRESH)                 # P(keep) = 1 - p
        xd = jnp.where(keep, x_ref[...], 0.0)          # drop (unscaled)
        scale = _SCALE
    else:
        xd = x_ref[...]                                # eval mode: identity
        scale = 1.0

    # Linear(N -> 1, bias=False) as a lane-native weighted row reduction
    # (VPU/XLU); weight row broadcast over the batch tile, no MXU, no .T.
    s = jnp.sum(xd * w_ref[...], axis=-1, keepdims=True)
    # Survivor scale once per row (commutes with the sum and with ReLU).
    o_ref[...] = jnp.maximum(s * scale, 0.0)


def _pick_tb(batch, feat):
    """Batch tile: ~4 MiB of x per buffer (double-buffered ~8 MiB, inside every
    generation's default scoped-VMEM limit), rounded to a multiple of 8, and
    split into >= 2 blocks when the batch allows (v7x has 2 TensorCores)."""
    row_bytes = 4 * feat
    tb = (4 * 1024 * 1024) // max(row_bytes, 1)
    tb = max(8, min(1024, (tb // 8) * 8))
    tb = min(tb, max(8, ((batch + 7) // 8) * 8))        # not larger than batch
    if batch >= 16 and pl.cdiv(batch, tb) < 2:
        tb = max(8, (((batch + 1) // 2 + 7) // 8) * 8)  # give both TCs a block
    return tb


def net_forward(x, w, seed, *, training=True):
    """x: (B, N) or (N,) f32; w: (1, N) f32 (torch Linear layout); seed: int32."""
    squeeze = x.ndim == 1
    if squeeze:
        x = x[None, :]
    x = x.astype(jnp.float32)
    w = w.astype(jnp.float32)
    B, N = x.shape
    assert w.shape == (1, N)

    seed_arr = jnp.asarray(seed, dtype=jnp.int32).reshape((1,))
    TB = _pick_tb(B, N)
    n_blocks = pl.cdiv(B, TB)     # no host-side padding; Pallas masks the edge block

    out = pl.pallas_call(
        partial(dropout_linear_relu_kernel, training=training),
        out_shape=jax.ShapeDtypeStruct((B, 1), jnp.float32),
        grid=(n_blocks,),
        in_specs=[
            pl.BlockSpec(memory_space=pltpu.SMEM),       # seed scalar (whole array)
            pl.BlockSpec((TB, N), lambda i: (i, 0)),     # x batch tile
            pl.BlockSpec((1, N), lambda i: (0, 0)),      # weight, resident
        ],
        out_specs=pl.BlockSpec((TB, 1), lambda i: (i, 0)),
        compiler_params=pltpu.CompilerParams(
            dimension_semantics=("parallel",)),
    )(seed_arr, x, w)

    if squeeze:
        out = out[0]
    return out


if __name__ == "__main__":
    # Small shapes consistent with the module: Net(unit_nums) on an all-ones
    # input (original script uses a single 10000-vector; we use a small,
    # lane-aligned unit_nums=1024 with a batch of 8 rows).
    unit_nums = 1024
    batch = 8

    key = jax.random.PRNGKey(0)
    kw, kseed = jax.random.split(key)

    # torch.nn.Linear default init: U(-1/sqrt(N), 1/sqrt(N)).
    bound = 1.0 / (unit_nums ** 0.5)
    w = jax.random.uniform(kw, (1, unit_nums), dtype=jnp.float32,
                           minval=-bound, maxval=bound)
    x = jnp.ones((batch, unit_nums), dtype=jnp.float32)
    seed = jax.random.randint(kseed, (), 0, 2**31 - 1, dtype=jnp.int32)

    y = net_forward(x, w, seed, training=True)
    jax.block_until_ready(y)

    assert y.shape == (batch, 1)
    assert bool(jnp.all(y >= 0.0))           # ReLU output is non-negative
    assert bool(jnp.all(jnp.isfinite(y)))

    print("KERNEL_OK")
</pallas_src>

<mosaic_0001>
module attributes {stable_mosaic.version = 11 : i64} {
  func.func @dropout_linear_relu_kernel(%arg0: i32, %arg1: memref<1xi32, #tpu.memory_space<smem>>, %arg2: memref<8x1024xf32, #tpu.memory_space<vmem>>, %arg3: memref<1x1024xf32, #tpu.memory_space<vmem>>, %arg4: memref<8x1xf32, #tpu.memory_space<vmem>>) attributes {dimension_semantics = [#tpu.dimension_semantics<parallel>], iteration_bounds = array<i64: 1>, scalar_prefetch = 0 : i64, scratch_operands = 0 : i64, tpu.core_type = #tpu.core_type<tc>, window_params = [{transform_indices = @transform_0, window_bounds = array<i64: 1>}, {transform_indices = @transform_1, window_bounds = array<i64: 8, 1024>}, {pipeline_mode = #tpu.pipeline_mode<synchronous>, transform_indices = @transform_2, window_bounds = array<i64: 1, 1024>}, {transform_indices = @transform_3, window_bounds = array<i64: 8, 1>}]} {
    %0 = tpu.iota {dimensions = array<i32: 0>} : vector<8x1024xi32>
    %c8_i32 = arith.constant 8 : i32
    %1 = arith.muli %arg0, %c8_i32 : i32
    %2 = vector.broadcast %1 : i32 to vector<8x1024xi32>
    %3 = arith.addi %0, %2 : vector<8x1024xi32>
    %4 = tpu.iota {dimensions = array<i32: 1>} : vector<8x1024xi32>
    %c0 = arith.constant 0 : index
    %5 = memref.load %arg1[%c0] : memref<1xi32, #tpu.memory_space<smem>>
    %c-1640531527_i32 = arith.constant -1640531527 : i32
    %6 = vector.broadcast %c-1640531527_i32 : i32 to vector<8x1024xi32>
    %7 = arith.addi %3, %6 : vector<8x1024xi32>
    %c6_i32 = arith.constant 6 : i32
    %8 = arith.shli %5, %c6_i32 : i32
    %9 = vector.broadcast %8 : i32 to vector<8x1024xi32>
    %10 = arith.addi %7, %9 : vector<8x1024xi32>
    %c2_i32 = arith.constant 2 : i32
    %11 = arith.shrui %5, %c2_i32 : i32
    %12 = vector.broadcast %11 : i32 to vector<8x1024xi32>
    %13 = arith.addi %10, %12 : vector<8x1024xi32>
    %14 = vector.broadcast %5 : i32 to vector<8x1024xi32>
    %15 = arith.xori %14, %13 : vector<8x1024xi32>
    %c-1640531527_i32_0 = arith.constant -1640531527 : i32
    %16 = vector.broadcast %c-1640531527_i32_0 : i32 to vector<8x1024xi32>
    %17 = arith.addi %4, %16 : vector<8x1024xi32>
    %c6_i32_1 = arith.constant 6 : i32
    %18 = vector.broadcast %c6_i32_1 : i32 to vector<8x1024xi32>
    %19 = arith.shli %15, %18 : vector<8x1024xi32>
    %20 = arith.addi %17, %19 : vector<8x1024xi32>
    %c2_i32_2 = arith.constant 2 : i32
    %21 = vector.broadcast %c2_i32_2 : i32 to vector<8x1024xi32>
    %22 = arith.shrui %15, %21 : vector<8x1024xi32>
    %23 = arith.addi %20, %22 : vector<8x1024xi32>
    %24 = arith.xori %15, %23 : vector<8x1024xi32>
    %c16_i32 = arith.constant 16 : i32
    %25 = vector.broadcast %c16_i32 : i32 to vector<8x1024xi32>
    %26 = arith.shrui %24, %25 : vector<8x1024xi32>
    %27 = arith.xori %24, %26 : vector<8x1024xi32>
    %c3_i32 = arith.constant 3 : i32
    %28 = vector.broadcast %c3_i32 : i32 to vector<8x1024xi32>
    %29 = arith.shli %27, %28 : vector<8x1024xi32>
    %30 = arith.addi %27, %29 : vector<8x1024xi32>
    %c11_i32 = arith.constant 11 : i32
    %31 = vector.broadcast %c11_i32 : i32 to vector<8x1024xi32>
    %32 = arith.shrui %30, %31 : vector<8x1024xi32>
    %33 = arith.xori %30, %32 : vector<8x1024xi32>
    %c15_i32 = arith.constant 15 : i32
    %34 = vector.broadcast %c15_i32 : i32 to vector<8x1024xi32>
    %35 = arith.shli %33, %34 : vector<8x1024xi32>
    %36 = arith.addi %33, %35 : vector<8x1024xi32>
    %c16_i32_3 = arith.constant 16 : i32
    %37 = vector.broadcast %c16_i32_3 : i32 to vector<8x1024xi32>
    %38 = arith.shrui %36, %37 : vector<8x1024xi32>
    %39 = arith.xori %36, %38 : vector<8x1024xi32>
    %c-2147483648_i32 = arith.constant -2147483648 : i32
    %40 = vector.broadcast %c-2147483648_i32 : i32 to vector<8x1024xi32>
    %41 = arith.cmpi uge, %39, %40 : vector<8x1024xi32>
    %c0_4 = arith.constant 0 : index
    %c0_5 = arith.constant 0 : index
    %42 = vector.load %arg2[%c0_4, %c0_5] : memref<8x1024xf32, #tpu.memory_space<vmem>>, vector<8x1024xf32>
    %cst = arith.constant 0.000000e+00 : f32
    %43 = vector.broadcast %cst : f32 to vector<8x1024xf32>
    %44 = arith.select %41, %42, %43 : vector<8x1024xi1>, vector<8x1024xf32>
    %c0_6 = arith.constant 0 : index
    %c0_7 = arith.constant 0 : index
    %45 = vector.load %arg3[%c0_6, %c0_7] : memref<1x1024xf32, #tpu.memory_space<vmem>>, vector<1x1024xf32>
    %46 = vector.broadcast %45 : vector<1x1024xf32> to vector<8x1024xf32>
    %47 = arith.mulf %44, %46 : vector<8x1024xf32>
    %cst_8 = arith.constant dense<0.000000e+00> : vector<8xf32>
    %48 = vector.multi_reduction <add>, %47, %cst_8 [1] : vector<8x1024xf32> to vector<8xf32>
    %49 = vector.shape_cast %48 : vector<8xf32> to vector<8x1xf32>
    %cst_9 = arith.constant 2.000000e+00 : f32
    %50 = vector.broadcast %cst_9 : f32 to vector<8x1xf32>
    %51 = arith.mulf %49, %50 : vector<8x1xf32>
    %cst_10 = arith.constant 0.000000e+00 : f32
    %52 = vector.broadcast %cst_10 : f32 to vector<8x1xf32>
    %53 = arith.maximumf %51, %52 : vector<8x1xf32>
    %c0_11 = arith.constant 0 : index
    %c0_12 = arith.constant 0 : index
    %54 = vector.load %arg4[%c0_11, %c0_12] : memref<8x1xf32, #tpu.memory_space<vmem>>, vector<8x1xf32>
    tpu.vector_store %arg4[%c0_11, %c0_12], %53 {strides = array<i32>} : memref<8x1xf32, #tpu.memory_space<vmem>>, vector<8x1xf32>,
    return
  }
  func.func @transform_0(%arg0: i32) -> i32 {
    %c0_i32 = arith.constant 0 : i32
    %c0_i32_0 = arith.constant 0 : i32
    return %c0_i32 : i32
  }
  func.func @transform_1(%arg0: i32) -> (i32, i32) {
    %c0_i32 = arith.constant 0 : i32
    %c0_i32_0 = arith.constant 0 : i32
    return %arg0, %c0_i32 : i32, i32
  }
  func.func @transform_2(%arg0: i32) -> (i32, i32) {
    %c0_i32 = arith.constant 0 : i32
    %c0_i32_0 = arith.constant 0 : i32
    %c0_i32_1 = arith.constant 0 : i32
    return %c0_i32, %c0_i32_0 : i32, i32
  }
  func.func @transform_3(%arg0: i32) -> (i32, i32) {
    %c0_i32 = arith.constant 0 : i32
    %c0_i32_0 = arith.constant 0 : i32
    return %arg0, %c0_i32 : i32, i32
  }
}

</mosaic_0001>

<bundles_post_ra>
// kernel: tpu_custom_call.1
= control target key start
LH: loop header
LB: loop body
LE: loop exit
PB: predicated region body
PF: predicated region fallthrough
CT: control target
= control target key end

     0   :  { %9 = vsyncpa [#allocation4], 0  ;;  %s410_s0 = inlined_call_operand.<no memory space> [shape: s32[1], index: 0, kind: input, shape index: {}]   ;;  %s411_s1 = inlined_call_operand.hbm [shape: f32[8,1024], index: 1, kind: input, shape index: {}]   ;;  %s412_s2 = inlined_call_operand.hbm [shape: f32[1,1024], index: 2, kind: input, shape index: {}]   ;;  %s413_s3 = inlined_call_operand.vmem [shape: f32[8,1], index: 3, kind: output, shape index: {}]  }
   0x1   :  { %10 = vsyncpa [#allocation6], 0  ;;  %s320_s12 = smov [#allocation3]   ;;  %s321_s14 = smov [#allocation5]  }
   0x2   :  { %s19_s13 = sshll.u32 %s320_s12, 4  ;;  %s29_s15 = sshll.u32 %s321_s14, 4  ;;  %s20_s13 = int_to_ptr.vmem [resolvable:$true] %s19_s13  ;;  %s30_s15 = int_to_ptr.vmem [resolvable:$true] %s29_s15 }
   0x3   :  { %s272_s18 = scalar_lea.hbm %s411_s1, 1024 }
   0x4   :  { %p273_p0 = scmp.ne.s32.totalorder %s411_s1, %s272_s18  ;;  %p276_p1 = scmp.lt.u32.totalorder %s272_s18, %s411_s1 }
   0x6   :  { %p278_p2 = pnand %p276_p1, %p273_p0 }
   0x8   :  { %281 = shalt.err (!%p278_p2)
}
   0x9   :  { %s282_s23 = scalar_lea.vmem %s20_s13, 1024  ;;  %p287_p4 = scmp.lt.s32.totalorder %s20_s13, %s20_s13 }
   0xa   :  { %p283_p3 = scmp.ne.s32.totalorder %s20_s13, %s282_s23  ;;  %p288_p5 = scmp.lt.s32.totalorder %s282_s23, %s282_s23 }
   0xc   :  { %p289_p6 = por %p288_p5, %p287_p4 }
   0xe   :  { %p290_p7 = pnand %p289_p6, %p283_p3 }
  0x10   :  { %293 = shalt.err (!%p290_p7)
}
  0x11   :  { %22 = dma.hbm_to_vmem [thread:$0]  %s411_s1, 1024, %s20_s13, [#allocation4]  }
  0x12   :  { %s294_s28 = scalar_lea.hbm %s412_s2, 128 }
  0x13   :  { %p295_p8 = scmp.ne.s32.totalorder %s412_s2, %s294_s28  ;;  %p298_p9 = scmp.lt.u32.totalorder %s294_s28, %s412_s2 }
  0x15   :  { %p300_p10 = pnand %p298_p9, %p295_p8 }
  0x17   :  { %303 = shalt.err (!%p300_p10)
}
  0x18   :  { %s304_s6 = scalar_lea.vmem %s30_s15, 128  ;;  %p309_p12 = scmp.lt.s32.totalorder %s30_s15, %s30_s15 }
  0x19   :  { %p305_p11 = scmp.ne.s32.totalorder %s30_s15, %s304_s6  ;;  %p310_p13 = scmp.lt.s32.totalorder %s304_s6, %s304_s6 }
  0x1b   :  { %p311_p0 = por %p310_p13, %p309_p12 }
  0x1d   :  { %p312_p1 = pnand %p311_p0, %p305_p11 }
  0x1f   :  { %315 = shalt.err (!%p312_p1)
}
  0x20   :  { %32 = dma.hbm_to_vmem [thread:$0]  %s412_s2, 128, %s30_s15, [#allocation6]  }
  0x21   :  { %316 = dma.done.wait [#allocation4], 1024  }
  0x22   :  { %317 = vsyncadd [#allocation4], 4294966272 }
  0x23   :  { %318 = dma.done.wait [#allocation6], 128  }
  0x24   :  { %319 = vsyncadd [#allocation6], 4294967168  ;;  %v39_v0 = vlaneseq  ;;  %s55_s10 = sshll.u32 %s410_s0, 6  ;;  %s58_s13 = sshrl.u32 %s410_s0, 2  ;;  %v61_v14 = vstv %s410_s0  ;;  %v379_v23 = vld [vmem:[#allocation5] sm:$0xff]  ;;  %vm262_vm8 = vcmask 7168  }
  0x25   :  { %v56_v3 = vstv %s55_s10  ;;  %v59_v7 = vstv %s58_s13 }
  0x26   :  { %v369_v1 = vshrl.u32 %v39_v0, 7  ;;  %v45_v2 = vand.u32 127, %v39_v0 }
  0x28   :  { %v54_v4 = vadd.s32 2654435769, %v369_v1  ;;  %v46_v5 = vadd.s32 128, %v45_v2  ;;  %v47_v6 = vadd.s32 256, %v45_v2  ;;  %v48_v8 = vadd.s32 384, %v45_v2 }
  0x29   :  { %v49_v9 = vadd.s32 512, %v45_v2  ;;  %v50_v11 = vadd.s32 640, %v45_v2  ;;  %v51_v12 = vadd.s32 768, %v45_v2  ;;  %v52_v13 = vadd.s32 896, %v45_v2 }
  0x2a   :  { %v57_v10 = vadd.s32 %v56_v3, %v54_v4  ;;  %v63_v16 = vadd.s32 2654435769, %v45_v2  ;;  %v64_v17 = vadd.s32 2654435769, %v46_v5  ;;  %v65_v18 = vadd.s32 2654435769, %v47_v6 }
  0x2b   :  { %v205_v19 = vsub.s32 0, %v369_v1  ;;  %v66_v21 = vadd.s32 2654435769, %v48_v8  ;;  %v67_v22 = vadd.s32 2654435769, %v49_v9  ;;  %v209_v29 = vsub.s32 1, %v369_v1 }
  0x2c   :  { %v60_v15 = vadd.s32 %v59_v7, %v57_v10  ;;  %v68_v24 = vadd.s32 2654435769, %v50_v11  ;;  %v69_v25 = vadd.s32 2654435769, %v51_v12  ;;  %v70_v26 = vadd.s32 2654435769, %v52_v13 }
  0x2d   :  { %v383_v30 = vrot.slane %v379_v23, %v205_v19  ;;  %v213_v31 = vsub.s32 2, %v369_v1  ;;  %v217_v32 = vsub.s32 3, %v369_v1  ;;  %v221_v33 = vsub.s32 4, %v369_v1 }
  0x2e   :  { %v62_v20 = vxor.u32 %v61_v14, %v60_v15 }
  0x30   :  { %v71_v27 = vshll.u32 %v62_v20, 6  ;;  %v80_v28 = vshrl.u32 %v62_v20, 2 }
  0x32   :  { %v72_v34 = vadd.s32 %v71_v27, %v63_v16  ;;  %v73_v35 = vadd.s32 %v71_v27, %v64_v17  ;;  %v74_v36 = vadd.s32 %v71_v27, %v65_v18  ;;  %v75_v37 = vadd.s32 %v71_v27, %v66_v21 }
  0x33   :  { %v76_v38 = vadd.s32 %v71_v27, %v67_v22  ;;  %v77_v39 = vadd.s32 %v71_v27, %v68_v24  ;;  %v78_v40 = vadd.s32 %v71_v27, %v69_v25  ;;  %v79_v41 = vadd.s32 %v71_v27, %v70_v26 }
  0x34   :  { %v81_v42 = vadd.s32 %v80_v28, %v72_v34  ;;  %v82_v43 = vadd.s32 %v80_v28, %v73_v35  ;;  %v83_v44 = vadd.s32 %v80_v28, %v74_v36  ;;  %v84_v45 = vadd.s32 %v80_v28, %v75_v37 }
  0x35   :  { %v85_v46 = vadd.s32 %v80_v28, %v76_v38  ;;  %v86_v47 = vadd.s32 %v80_v28, %v77_v39  ;;  %v87_v48 = vadd.s32 %v80_v28, %v78_v40  ;;  %v88_v49 = vadd.s32 %v80_v28, %v79_v41 }
  0x36   :  { %v89_v50 = vxor.u32 %v81_v42, %v62_v20  ;;  %v90_v51 = vxor.u32 %v82_v43, %v62_v20  ;;  %v91_v52 = vxor.u32 %v83_v44, %v62_v20  ;;  %v92_v53 = vxor.u32 %v84_v45, %v62_v20 }
  0x37   :  { %v93_v54 = vxor.u32 %v85_v46, %v62_v20  ;;  %v94_v55 = vxor.u32 %v86_v47, %v62_v20  ;;  %v95_v56 = vxor.u32 %v87_v48, %v62_v20  ;;  %v96_v57 = vxor.u32 %v88_v49, %v62_v20 }
  0x38   :  { %v97_v58 = vshrl.u32 %v89_v50, 16  ;;  %v98_v59 = vshrl.u32 %v90_v51, 16  ;;  %v99_v60 = vshrl.u32 %v91_v52, 16  ;;  %v100_v61 = vshrl.u32 %v92_v53, 16 }
  0x39   :  { %v101_v62 = vshrl.u32 %v93_v54, 16  ;;  %v102_v63 = vshrl.u32 %v94_v55, 16  ;;  %v103_v0 = vshrl.u32 %v95_v56, 16  ;;  %v104_v2 = vshrl.u32 %v96_v57, 16 }
  0x3a   :  { %v105_v3 = vxor.u32 %v97_v58, %v89_v50  ;;  %v106_v4 = vxor.u32 %v98_v59, %v90_v51  ;;  %v107_v5 = vxor.u32 %v99_v60, %v91_v52  ;;  %v108_v6 = vxor.u32 %v100_v61, %v92_v53 }
  0x3b   :  { %v109_v7 = vxor.u32 %v101_v62, %v93_v54  ;;  %v110_v8 = vxor.u32 %v102_v63, %v94_v55  ;;  %v111_v9 = vxor.u32 %v103_v0, %v95_v56  ;;  %v112_v10 = vxor.u32 %v104_v2, %v96_v57 }
  0x3c   :  { %v113_v11 = vshll.u32 %v105_v3, 3  ;;  %v114_v12 = vshll.u32 %v106_v4, 3  ;;  %v115_v13 = vshll.u32 %v107_v5, 3  ;;  %v116_v14 = vshll.u32 %v108_v6, 3 }
  0x3d   :  { %v117_v15 = vshll.u32 %v109_v7, 3  ;;  %v118_v16 = vshll.u32 %v110_v8, 3  ;;  %v119_v17 = vshll.u32 %v111_v9, 3  ;;  %v120_v18 = vshll.u32 %v112_v10, 3 }
  0x3e   :  { %v121_v19 = vadd.s32 %v113_v11, %v105_v3  ;;  %v122_v20 = vadd.s32 %v114_v12, %v106_v4  ;;  %v123_v21 = vadd.s32 %v115_v13, %v107_v5  ;;  %v124_v22 = vadd.s32 %v116_v14, %v108_v6 }
  0x3f   :  { %v125_v24 = vadd.s32 %v117_v15, %v109_v7  ;;  %v126_v25 = vadd.s32 %v118_v16, %v110_v8  ;;  %v127_v26 = vadd.s32 %v119_v17, %v111_v9  ;;  %v128_v27 = vadd.s32 %v120_v18, %v112_v10  ;;  %v185_v17 = vld [vmem:[#allocation3] sm:$0xff]  ;;  %v186_v18 = vld [vmem:[#allocation3 + $0x8] sm:$0xff] }
  0x40   :  { %v129_v28 = vshrl.u32 %v121_v19, 11  ;;  %v130_v34 = vshrl.u32 %v122_v20, 11  ;;  %v131_v35 = vshrl.u32 %v123_v21, 11  ;;  %v132_v36 = vshrl.u32 %v124_v22, 11 }
  0x41   :  { %v133_v37 = vshrl.u32 %v125_v24, 11  ;;  %v134_v38 = vshrl.u32 %v126_v25, 11  ;;  %v135_v39 = vshrl.u32 %v127_v26, 11  ;;  %v136_v40 = vshrl.u32 %v128_v27, 11 }
  0x42   :  { %v137_v41 = vxor.u32 %v129_v28, %v121_v19  ;;  %v138_v42 = vxor.u32 %v130_v34, %v122_v20  ;;  %v139_v43 = vxor.u32 %v131_v35, %v123_v21  ;;  %v140_v44 = vxor.u32 %v132_v36, %v124_v22  ;;  %v187_v19 = vld [vmem:[#allocation3 + $0x10] sm:$0xff]  ;;  %v188_v21 = vld [vmem:[#allocation3 + $0x18] sm:$0xff] }
  0x43   :  { %v141_v45 = vxor.u32 %v133_v37, %v125_v24  ;;  %v142_v46 = vxor.u32 %v134_v38, %v126_v25  ;;  %v143_v47 = vxor.u32 %v135_v39, %v127_v26  ;;  %v144_v48 = vxor.u32 %v136_v40, %v128_v27  ;;  %v189_v25 = vld [vmem:[#allocation3 + $0x20] sm:$0xff]  ;;  %v190_v37 = vld [vmem:[#allocation3 + $0x28] sm:$0xff] }
  0x44   :  { %v145_v49 = vshll.u32 %v137_v41, 15  ;;  %v146_v50 = vshll.u32 %v138_v42, 15  ;;  %v147_v51 = vshll.u32 %v139_v43, 15  ;;  %v148_v52 = vshll.u32 %v140_v44, 15 }
  0x45   :  { %v149_v53 = vshll.u32 %v141_v45, 15  ;;  %v150_v54 = vshll.u32 %v142_v46, 15  ;;  %v151_v55 = vshll.u32 %v143_v47, 15  ;;  %v152_v56 = vshll.u32 %v144_v48, 15 }
  0x46   :  { %v153_v57 = vadd.s32 %v145_v49, %v137_v41  ;;  %v154_v58 = vadd.s32 %v146_v50, %v138_v42  ;;  %v155_v59 = vadd.s32 %v147_v51, %v139_v43  ;;  %v156_v60 = vadd.s32 %v148_v52, %v140_v44  ;;  %v191_v42 = vld [vmem:[#allocation3 + $0x30] sm:$0xff] }
  0x47   :  { %v157_v61 = vadd.s32 %v149_v53, %v141_v45  ;;  %v158_v62 = vadd.s32 %v150_v54, %v142_v46  ;;  %v159_v63 = vadd.s32 %v151_v55, %v143_v47  ;;  %v160_v0 = vadd.s32 %v152_v56, %v144_v48 }
  0x48   :  { %v161_v2 = vshrl.u32 %v153_v57, 16  ;;  %v162_v3 = vshrl.u32 %v154_v58, 16  ;;  %v163_v4 = vshrl.u32 %v155_v59, 16  ;;  %v164_v5 = vshrl.u32 %v156_v60, 16 }
  0x49   :  { %v165_v6 = vshrl.u32 %v157_v61, 16  ;;  %v166_v7 = vshrl.u32 %v158_v62, 16  ;;  %v167_v8 = vshrl.u32 %v159_v63, 16  ;;  %v210_v9 = vrot.slane %v379_v23, %v209_v29 }
  0x4a   :  { %v169_v10 = vxor.u32 %v161_v2, %v153_v57  ;;  %v170_v11 = vxor.u32 %v162_v3, %v154_v58  ;;  %v171_v12 = vxor.u32 %v163_v4, %v155_v59  ;;  %v172_v13 = vxor.u32 %v164_v5, %v156_v60 }
  0x4b   :  { %v168_v14 = vshrl.u32 %v160_v0, 16  ;;  %v173_v15 = vxor.u32 %v165_v6, %v157_v61  ;;  %v174_v16 = vxor.u32 %v166_v7, %v158_v62  ;;  %v214_v20 = vrot.slane %v379_v23, %v213_v31 }
  0x4c   :  { %vm177_vm0 = vcmp.ge.u32.totalorder %v169_v10, 2147483648  ;;  %vm178_vm1 = vcmp.ge.u32.totalorder %v170_v11, 2147483648  ;;  %vm179_vm2 = vcmp.ge.u32.totalorder %v171_v12, 2147483648  ;;  %vm180_vm3 = vcmp.ge.u32.totalorder %v172_v13, 2147483648 }
  0x4d   :  { %v175_v29 = vxor.u32 %v167_v8, %v159_v63  ;;  %v218_v22 = vrot.slane %v379_v23, %v217_v32  ;;  %v225_v24 = vsub.s32 5, %v369_v1  ;;  %vm181_vm4 = vcmp.ge.u32.totalorder %v173_v15, 2147483648 }
  0x4e   :  { %v193_v26 = vsel %vm177_vm0, %v185_v17, 0.0  ;;  %v194_v27 = vsel %vm178_vm1, %v186_v18, 0.0  ;;  %v195_v28 = vsel %vm179_vm2, %v187_v19, 0.0  ;;  %v176_v34 = vxor.u32 %v168_v14, %v160_v0 }
  0x4f   :  { %v196_v35 = vsel %vm180_vm3, %v188_v21, 0.0  ;;  %v222_v31 = vrot.slane %v379_v23, %v221_v33  ;;  %v229_v36 = vsub.s32 6, %v369_v1  ;;  %vm182_vm5 = vcmp.ge.u32.totalorder %v174_v16, 2147483648  ;;  %v192_v33 = vld [vmem:[#allocation3 + $0x38] sm:$0xff] }
  0x50   :  { %v243_v38 = vmul.f32 %v383_v30, %v193_v26  ;;  %v244_v32 = vmul.f32 %v210_v9, %v194_v27  ;;  %v245_v39 = vmul.f32 %v214_v20, %v195_v28  ;;  %v197_v40 = vsel %vm181_vm4, %v189_v25, 0.0 }
  0x51   :  { %v233_v41 = vsub.s32 7, %v369_v1  ;;  %vm183_vm6 = vcmp.ge.u32.totalorder %v175_v29, 2147483648  ;;  %v226_v43 = vrot.slane %v379_v23, %v225_v24  ;;  %v246_v44 = vmul.f32 %v218_v22, %v196_v35 }
  0x52   :  { %v251_v45 = vadd.f32 %v244_v32, %v243_v38  ;;  %v198_v46 = vsel %vm182_vm5, %v190_v37, 0.0  ;;  %vm184_vm7 = vcmp.ge.u32.totalorder %v176_v34, 2147483648  ;;  %v230_v47 = vrot.slane %v379_v23, %v229_v36 }
  0x53   :  { %v247_v48 = vmul.f32 %v222_v31, %v197_v40  ;;  %v199_v50 = vsel %vm183_vm6, %v191_v42, 0.0  ;;  %v234_v30 = vrot.slane %v379_v23, %v233_v41  ;;  %v248_v51 = vmul.f32 %v226_v43, %v198_v46 }
  0x54   :  { %v252_v49 = vadd.f32 %v251_v45, %v245_v39  ;;  %v200_v53 = vsel %vm184_vm7, %v192_v33, 0.0  ;;  %v249_v1 = vmul.f32 %v230_v47, %v199_v50 }
  0x55   :  { %v250_v55 = vmul.f32 %v234_v30, %v200_v53 }
  0x56   :  { %v253_v52 = vadd.f32 %v252_v49, %v246_v44 }
  0x58   :  { %v254_v54 = vadd.f32 %v253_v52, %v247_v48 }
  0x5a   :  { %v255_v56 = vadd.f32 %v254_v54, %v248_v51 }
  0x5c   :  { %v256_v57 = vadd.f32 %v255_v56, %v249_v1 }
  0x5e   :  { %v257_v58 = vadd.f32 %v256_v57, %v250_v55 }
  0x60   :  { %258 = vadd.xlane.f32.xlu0 %v257_v58 }
  0xed   :  { %v259_v59 = vpop.xlane.xlu0 %258 }
  0xee   :  { %v260_v60 = vmul.f32 2.0, %v259_v59 }
  0xf0   :  { %v261_v61 = vmax.f32 %v260_v60, 0.0 }
  0xf2   :  { %263 = vst.msk [vmem:[%s413_s3] sm:$0xff] %vm262_vm8, %v261_v61 }
  0xf3   :  { %268 = vsyncpa [#allocation4], 1 }
  0xf4   :  { %269 = vsyncpa [#allocation6], 1 }

</bundles_post_ra>
